<compile_context>
chip_gen: v5e
topology: v5e:2x2
jax: 0.10.0
libtpu: 0.0.40
codegen_flags: <defaults>
</compile_context>

<pallas_src>
import functools

import jax
import jax.numpy as jnp
from jax import lax
from jax.experimental import pallas as pl
from jax.experimental.pallas import tpu as pltpu

LANES = 128


def _round_up(x, m):
    return ((x + m - 1) // m) * m


def _ssd_kernel(f1_ref, f2_ref, f3_ref, f4_ref, acc_ref, *,
                sub, tile_rows, tiles_per_p, rows_valid, needs_mask, unroll):
    # acc_ref is an (8, 128) f32 output block, resident across the inner
    # ("arbitrary") grid axis; one block per parallel index p.
    @pl.when(pl.program_id(1) == 0)
    def _():
        acc_ref[...] = jnp.zeros_like(acc_ref)

    tile_base = (pl.program_id(0) * tiles_per_p + pl.program_id(1)) * tile_rows
    n_slabs = tile_rows // sub

    def body(s, acc):
        r0 = pl.multiple_of(s * sub, sub)
        a = f1_ref[pl.ds(r0, sub), :]
        b = f2_ref[pl.ds(r0, sub), :]
        c = f3_ref[pl.ds(r0, sub), :]
        d = f4_ref[pl.ds(r0, sub), :]
        if a.dtype != jnp.float32:
            a = a.astype(jnp.float32)
            b = b.astype(jnp.float32)
            c = c.astype(jnp.float32)
            d = d.astype(jnp.float32)
        d12 = a - b
        d23 = b - c
        d34 = c - d
        d41 = d - a
        sq = d12 * d12 + d23 * d23 + d34 * d34 + d41 * d41   # (sub, 128) f32
        if needs_mask:
            # Global row index of every element in this slab; rows >= rows_valid
            # are padding / clamped re-reads and must contribute 0.
            row = (tile_base + r0
                   + lax.broadcasted_iota(jnp.int32, (sub, LANES), 0))
            sq = jnp.where(row < rows_valid, sq, 0.0)
        if sub != 8:  # narrow dtypes: fold packed sublanes down to one vreg
            sq = sq.reshape(sub // 8, 8, LANES).sum(axis=0)
        return acc + sq

    partial = lax.fori_loop(0, n_slabs, body,
                            jnp.zeros((8, LANES), jnp.float32),
                            unroll=unroll)
    acc_ref[...] += partial


@functools.partial(jax.jit, static_argnames=("rows_per_tile",))
def multi_consist_loss(f1, f2, f3, f4, rows_per_tile=None):
    assert f1.shape == f2.shape == f3.shape == f4.shape
    assert f1.dtype == f2.dtype == f3.dtype == f4.dtype

    n_elems = f1.size
    itemsize = jnp.dtype(f1.dtype).itemsize
    # Sublane multiple: 8 for 32-bit, 16 for bf16, 32 for 8-bit dtypes.
    sub = 8 * max(1, 4 // itemsize)
    if rows_per_tile is None:
        # ~1 MiB per input block -> 4 inputs x 2 buffers = 8 MiB VMEM,
        # safe under every generation's scoped-VMEM default (16 MiB on v5e).
        rows_per_tile = max(sub, (1 << 20) // (LANES * itemsize))

    flats = [f.reshape(-1) for f in (f1, f2, f3, f4)]
    rows = n_elems // LANES
    main = rows * LANES
    tail = n_elems - main

    # Sub-128 ragged tail folded in plain JAX; identical handling on all four
    # tensors, no full-tensor pad/copy.
    tail_ssd = jnp.float32(0.0)
    if tail:
        ta, tb, tc, td = (x[main:].astype(jnp.float32) for x in flats)
        tail_ssd = jnp.sum((ta - tb) ** 2 + (tb - tc) ** 2
                           + (tc - td) ** 2 + (td - ta) ** 2)

    if rows == 0:
        # Input smaller than one lane row; nothing for the kernel to do.
        return tail_ssd / (4.0 * n_elems)

    if tail:
        slabs = [x[:main].reshape(rows, LANES) for x in flats]
    else:
        slabs = [x.reshape(rows, LANES) for x in flats]   # pure reshape, no copy

    # Tile selection: num_tiles rounded up to the parallel factor P, tile_rows
    # rounded up to the sublane multiple only.  Any resulting padding lives in
    # the last tile(s) and is masked in-kernel.
    desired_tiles = pl.cdiv(rows, rows_per_tile)
    P = 2 if desired_tiles >= 2 else 1        # both v7x TensorCores; harmless on 1-TC chips
    num_tiles = _round_up(desired_tiles, P)
    tile_rows = _round_up(pl.cdiv(rows, num_tiles), sub)
    tiles_per_p = num_tiles // P
    needs_mask = (num_tiles * tile_rows != rows)

    n_valid_blocks = pl.cdiv(rows, tile_rows)
    last_block = n_valid_blocks - 1
    if num_tiles > n_valid_blocks:
        # Extra tiles from the P / sublane round-up: clamp their block index
        # onto the last valid block (no fully-OOB DMA); the in-kernel row mask
        # zeroes their contribution.
        in_map = lambda p, i: (jnp.minimum(p * tiles_per_p + i, last_block), 0)
    else:
        in_map = lambda p, i: (p * tiles_per_p + i, 0)

    tile_spec = pl.BlockSpec((tile_rows, LANES), in_map)
    out_spec = pl.BlockSpec((8, LANES), lambda p, i: (p, 0))

    n_slabs = tile_rows // sub
    unroll = next(u for u in (8, 4, 2, 1) if n_slabs % u == 0)

    kernel = functools.partial(
        _ssd_kernel, sub=sub, tile_rows=tile_rows, tiles_per_p=tiles_per_p,
        rows_valid=rows, needs_mask=needs_mask, unroll=unroll)

    cost = pl.CostEstimate(
        flops=12 * n_elems,
        transcendentals=0,
        bytes_accessed=4 * main * itemsize + P * 8 * LANES * 4)

    partials = pl.pallas_call(
        kernel,
        out_shape=jax.ShapeDtypeStruct((P * 8, LANES), jnp.float32),
        grid_spec=pltpu.PrefetchScalarGridSpec(
            num_scalar_prefetch=0,
            grid=(P, tiles_per_p),
            in_specs=[tile_spec, tile_spec, tile_spec, tile_spec],
            out_specs=out_spec,
        ),
        compiler_params=pltpu.CompilerParams(
            dimension_semantics=("parallel", "arbitrary"),
        ),
        cost_estimate=cost,
    )(*slabs)

    # Tiny final cross-lane reduce + the /N of each MSE and the /4 average.
    return (jnp.sum(partials) + tail_ssd) / (4.0 * n_elems)


def _reference(f1, f2, f3, f4):
    def mse(x, y):
        return jnp.mean((x - y) ** 2)

    return (mse(f1, f2) + mse(f2, f3) + mse(f3, f4) + mse(f4, f1)) / 4.0


if __name__ == "__main__":
    base_key = jax.random.PRNGKey(0)

    def make(shape, tag):
        ks = jax.random.split(jax.random.fold_in(base_key, tag), 4)
        return [jax.random.normal(ks[i], shape, dtype=jnp.float32)
                for i in range(4)]

    # Case 1: small NCHW features, size divisible by 128 (zero-copy path).
    fs = make((2, 4, 16, 16), 0)
    loss = multi_consist_loss(*fs)
    jax.block_until_ready(loss)
    ref = _reference(*fs)
    assert jnp.allclose(loss, ref, rtol=1e-5, atol=1e-6), (loss, ref)

    # Case 2: ragged size (sub-128 tail in plain JAX + masked last block).
    gs = make((3, 5, 7, 11), 1)
    loss2 = multi_consist_loss(*gs)
    jax.block_until_ready(loss2)
    ref2 = _reference(*gs)
    assert jnp.allclose(loss2, ref2, rtol=1e-5, atol=1e-6), (loss2, ref2)

    # Case 3: multi-tile, even tile count -> P=2 parallel axis, no masking.
    hs = make((2, 4, 32, 64), 2)        # 16384 elems = 128 rows
    loss3 = multi_consist_loss(*hs, rows_per_tile=8)
    jax.block_until_ready(loss3)
    ref3 = _reference(*hs)
    assert jnp.allclose(loss3, ref3, rtol=1e-5, atol=1e-6), (loss3, ref3)

    # Case 4: odd valid-tile count -> P=2 with clamped extra tile + row mask.
    js = make((2, 4, 40, 40), 3)        # 12800 elems = 100 rows
    loss4 = multi_consist_loss(*js, rows_per_tile=8)
    jax.block_until_ready(loss4)
    ref4 = _reference(*js)
    assert jnp.allclose(loss4, ref4, rtol=1e-5, atol=1e-6), (loss4, ref4)

    print("KERNEL_OK")
</pallas_src>

<mosaic_0001>
module attributes {stable_mosaic.version = 11 : i64} {
  func.func @_ssd_kernel(%arg0: i32, %arg1: i32, %arg2: memref<16x128xf32, #tpu.memory_space<vmem>>, %arg3: memref<16x128xf32, #tpu.memory_space<vmem>>, %arg4: memref<16x128xf32, #tpu.memory_space<vmem>>, %arg5: memref<16x128xf32, #tpu.memory_space<vmem>>, %arg6: memref<8x128xf32, #tpu.memory_space<vmem>>) attributes {dimension_semantics = [#tpu.dimension_semantics<parallel>, #tpu.dimension_semantics<arbitrary>], iteration_bounds = array<i64: 1, 1>, scalar_prefetch = 0 : i64, scratch_operands = 0 : i64, tpu.core_type = #tpu.core_type<tc>, window_params = [{transform_indices = @transform_0, window_bounds = array<i64: 16, 128>}, {transform_indices = @transform_1, window_bounds = array<i64: 16, 128>}, {transform_indices = @transform_2, window_bounds = array<i64: 16, 128>}, {transform_indices = @transform_3, window_bounds = array<i64: 16, 128>}, {transform_indices = @transform_4, window_bounds = array<i64: 8, 128>}]} {
    %c0_i32 = arith.constant 0 : i32
    %0 = arith.cmpi eq, %arg1, %c0_i32 : i32
    %1 = arith.extui %0 : i1 to i32
    %c0_i32_0 = arith.constant 0 : i32
    %2 = arith.cmpi ne, %1, %c0_i32_0 : i32
    scf.if %2 {
      %cst_14 = arith.constant 0.000000e+00 : f32
      %51 = vector.broadcast %cst_14 : f32 to vector<8x128xf32>
      %c0_15 = arith.constant 0 : index
      %c0_16 = arith.constant 0 : index
      %52 = vector.load %arg6[%c0_15, %c0_16] : memref<8x128xf32, #tpu.memory_space<vmem>>, vector<8x128xf32>
      tpu.vector_store %arg6[%c0_15, %c0_16], %51 {strides = array<i32>} : memref<8x128xf32, #tpu.memory_space<vmem>>, vector<8x128xf32>,
    } else {
    }
    %cst = arith.constant 0.000000e+00 : f32
    %3 = vector.broadcast %cst : f32 to vector<8x128xf32>
    %c0_i32_1 = arith.constant 0 : i32
    %c8_i32 = arith.constant 8 : i32
    %4 = arith.muli %c0_i32_1, %c8_i32 : i32
    %5 = tpu.assume_multiple %4, 8 : i32
    %6 = arith.index_cast %5 : i32 to index
    %c0 = arith.constant 0 : index
    %7 = vector.load %arg2[%6, %c0] : memref<16x128xf32, #tpu.memory_space<vmem>>, vector<8x128xf32>
    %8 = arith.index_cast %5 : i32 to index
    %c0_2 = arith.constant 0 : index
    %9 = vector.load %arg3[%8, %c0_2] : memref<16x128xf32, #tpu.memory_space<vmem>>, vector<8x128xf32>
    %10 = arith.index_cast %5 : i32 to index
    %c0_3 = arith.constant 0 : index
    %11 = vector.load %arg4[%10, %c0_3] : memref<16x128xf32, #tpu.memory_space<vmem>>, vector<8x128xf32>
    %12 = arith.index_cast %5 : i32 to index
    %c0_4 = arith.constant 0 : index
    %13 = vector.load %arg5[%12, %c0_4] : memref<16x128xf32, #tpu.memory_space<vmem>>, vector<8x128xf32>
    %14 = arith.subf %7, %9 : vector<8x128xf32>
    %15 = arith.subf %9, %11 : vector<8x128xf32>
    %16 = arith.subf %11, %13 : vector<8x128xf32>
    %17 = arith.subf %13, %7 : vector<8x128xf32>
    %18 = arith.mulf %14, %14 : vector<8x128xf32>
    %19 = arith.mulf %15, %15 : vector<8x128xf32>
    %20 = arith.addf %18, %19 : vector<8x128xf32>
    %21 = arith.mulf %16, %16 : vector<8x128xf32>
    %22 = arith.addf %20, %21 : vector<8x128xf32>
    %23 = arith.mulf %17, %17 : vector<8x128xf32>
    %24 = arith.addf %22, %23 : vector<8x128xf32>
    %25 = arith.addf %3, %24 : vector<8x128xf32>
    %c1_i32 = arith.constant 1 : i32
    %c8_i32_5 = arith.constant 8 : i32
    %26 = arith.muli %c1_i32, %c8_i32_5 : i32
    %27 = tpu.assume_multiple %26, 8 : i32
    %28 = arith.index_cast %27 : i32 to index
    %c0_6 = arith.constant 0 : index
    %29 = vector.load %arg2[%28, %c0_6] : memref<16x128xf32, #tpu.memory_space<vmem>>, vector<8x128xf32>
    %30 = arith.index_cast %27 : i32 to index
    %c0_7 = arith.constant 0 : index
    %31 = vector.load %arg3[%30, %c0_7] : memref<16x128xf32, #tpu.memory_space<vmem>>, vector<8x128xf32>
    %32 = arith.index_cast %27 : i32 to index
    %c0_8 = arith.constant 0 : index
    %33 = vector.load %arg4[%32, %c0_8] : memref<16x128xf32, #tpu.memory_space<vmem>>, vector<8x128xf32>
    %34 = arith.index_cast %27 : i32 to index
    %c0_9 = arith.constant 0 : index
    %35 = vector.load %arg5[%34, %c0_9] : memref<16x128xf32, #tpu.memory_space<vmem>>, vector<8x128xf32>
    %36 = arith.subf %29, %31 : vector<8x128xf32>
    %37 = arith.subf %31, %33 : vector<8x128xf32>
    %38 = arith.subf %33, %35 : vector<8x128xf32>
    %39 = arith.subf %35, %29 : vector<8x128xf32>
    %40 = arith.mulf %36, %36 : vector<8x128xf32>
    %41 = arith.mulf %37, %37 : vector<8x128xf32>
    %42 = arith.addf %40, %41 : vector<8x128xf32>
    %43 = arith.mulf %38, %38 : vector<8x128xf32>
    %44 = arith.addf %42, %43 : vector<8x128xf32>
    %45 = arith.mulf %39, %39 : vector<8x128xf32>
    %46 = arith.addf %44, %45 : vector<8x128xf32>
    %47 = arith.addf %25, %46 : vector<8x128xf32>
    %c2_i32 = arith.constant 2 : i32
    %c0_10 = arith.constant 0 : index
    %c0_11 = arith.constant 0 : index
    %48 = vector.load %arg6[%c0_10, %c0_11] : memref<8x128xf32, #tpu.memory_space<vmem>>, vector<8x128xf32>
    %49 = arith.addf %48, %47 : vector<8x128xf32>
    %c0_12 = arith.constant 0 : index
    %c0_13 = arith.constant 0 : index
    %50 = vector.load %arg6[%c0_12, %c0_13] : memref<8x128xf32, #tpu.memory_space<vmem>>, vector<8x128xf32>
    tpu.vector_store %arg6[%c0_12, %c0_13], %49 {strides = array<i32>} : memref<8x128xf32, #tpu.memory_space<vmem>>, vector<8x128xf32>,
    return
  }
  func.func @transform_0(%arg0: i32, %arg1: i32) -> (i32, i32) {
    %c1_i32 = arith.constant 1 : i32
    %0 = arith.muli %arg0, %c1_i32 : i32
    %1 = arith.addi %0, %arg1 : i32
    %c0_i32 = arith.constant 0 : i32
    %c0_i32_0 = arith.constant 0 : i32
    return %1, %c0_i32 : i32, i32
  }
  func.func @transform_1(%arg0: i32, %arg1: i32) -> (i32, i32) {
    %c1_i32 = arith.constant 1 : i32
    %0 = arith.muli %arg0, %c1_i32 : i32
    %1 = arith.addi %0, %arg1 : i32
    %c0_i32 = arith.constant 0 : i32
    %c0_i32_0 = arith.constant 0 : i32
    return %1, %c0_i32 : i32, i32
  }
  func.func @transform_2(%arg0: i32, %arg1: i32) -> (i32, i32) {
    %c1_i32 = arith.constant 1 : i32
    %0 = arith.muli %arg0, %c1_i32 : i32
    %1 = arith.addi %0, %arg1 : i32
    %c0_i32 = arith.constant 0 : i32
    %c0_i32_0 = arith.constant 0 : i32
    return %1, %c0_i32 : i32, i32
  }
  func.func @transform_3(%arg0: i32, %arg1: i32) -> (i32, i32) {
    %c1_i32 = arith.constant 1 : i32
    %0 = arith.muli %arg0, %c1_i32 : i32
    %1 = arith.addi %0, %arg1 : i32
    %c0_i32 = arith.constant 0 : i32
    %c0_i32_0 = arith.constant 0 : i32
    return %1, %c0_i32 : i32, i32
  }
  func.func @transform_4(%arg0: i32, %arg1: i32) -> (i32, i32) {
    %c0_i32 = arith.constant 0 : i32
    %c0_i32_0 = arith.constant 0 : i32
    return %arg0, %c0_i32 : i32, i32
  }
}

</mosaic_0001>

<bundles_post_ra>
// kernel: multi_consist_loss.1
= control target key start
LH: loop header
LB: loop body
LE: loop exit
PB: predicated region body
PF: predicated region fallthrough
CT: control target
= control target key end

     0   :  { %s234_s0 = inlined_call_operand.vmem [shape: f32[16,128], index: 0, kind: input, shape index: {}]   ;;  %s235_s1 = inlined_call_operand.vmem [shape: f32[16,128], index: 1, kind: input, shape index: {}]   ;;  %s236_s2 = inlined_call_operand.vmem [shape: f32[16,128], index: 2, kind: input, shape index: {}]   ;;  %s237_s3 = inlined_call_operand.vmem [shape: f32[16,128], index: 3, kind: input, shape index: {}]   ;;  %s238_s4 = inlined_call_operand.vmem [shape: f32[8,128], index: 4, kind: output, shape index: {}]  }
   0x1   :  { %v110_v0 = vld [vmem:[%s234_s0] sm:$0xff]  ;;  %v177_v6 = vld [vmem:[%s234_s0 + $0x8] sm:$0xff] }
   0x2   :  { %v111_v1 = vld [vmem:[%s235_s1] sm:$0xff]  ;;  %v178_v7 = vld [vmem:[%s235_s1 + $0x8] sm:$0xff] }
   0x3   :  { %v112_v2 = vld [vmem:[%s236_s2] sm:$0xff]  ;;  %v114_v4 = vsub.f32 %v110_v0, %v111_v1  ;;  %v179_v10 = vld [vmem:[%s236_s2 + $0x8] sm:$0xff]  ;;  %v134_v12 = vsub.f32 %v177_v6, %v178_v7 }
   0x4   :  { %v113_v3 = vld [vmem:[%s237_s3] sm:$0xff]  ;;  %v115_v5 = vsub.f32 %v111_v1, %v112_v2  ;;  %v180_v11 = vld [vmem:[%s237_s3 + $0x8] sm:$0xff]  ;;  %v135_v15 = vsub.f32 %v178_v7, %v179_v10 }
   0x5   :  { %v116_v8 = vsub.f32 %v112_v2, %v113_v3  ;;  %v117_v9 = vsub.f32 %v113_v3, %v110_v0  ;;  %v118_v13 = vmul.f32 %v114_v4, %v114_v4  ;;  %v136_v16 = vsub.f32 %v179_v10, %v180_v11 }
   0x6   :  { %v119_v14 = vmul.f32 %v115_v5, %v115_v5  ;;  %v137_v18 = vsub.f32 %v180_v11, %v177_v6  ;;  %v138_v19 = vmul.f32 %v134_v12, %v134_v12  ;;  %v139_v22 = vmul.f32 %v135_v15, %v135_v15 }
   0x7   :  { %v121_v17 = vmul.f32 %v116_v8, %v116_v8  ;;  %v123_v21 = vmul.f32 %v117_v9, %v117_v9  ;;  %v141_v23 = vmul.f32 %v136_v16, %v136_v16 }
   0x8   :  { %v120_v20 = vadd.f32 %v119_v14, %v118_v13  ;;  %v140_v25 = vadd.f32 %v139_v22, %v138_v19  ;;  %v143_v26 = vmul.f32 %v137_v18, %v137_v18 }
   0xa   :  { %v122_v24 = vadd.f32 %v121_v17, %v120_v20  ;;  %v142_v28 = vadd.f32 %v141_v23, %v140_v25 }
   0xc   :  { %v124_v27 = vadd.f32 %v123_v21, %v122_v24  ;;  %v144_v29 = vadd.f32 %v143_v26, %v142_v28 }
   0xe   :  { %v145_v30 = vadd.f32 %v144_v29, %v124_v27 }
  0x10   :  { %148 = vst [vmem:[%s238_s4] sm:$0xff] %v145_v30 }

</bundles_post_ra>
